<compile_context>
chip_gen: v5e
topology: v5e:2x2
jax: 0.10.0
libtpu: 0.0.40
codegen_flags: <defaults>
</compile_context>

<pallas_src>
import jax
import jax.numpy as jnp
from jax.experimental import pallas as pl
from jax.experimental.pallas import tpu as pltpu


# ----------------------------- Pallas kernel ------------------------------ #
def _affine_kernel(wb_ref, x_ref, o_ref):
    # wb_ref: (Rt, 2) f32   column 0 = per-row scale, column 1 = per-row shift
    # x_ref, o_ref: (Rt, Ct) lane-dense tile of the flattened (N*C, H*W) input
    wb = wb_ref[...]
    w = wb[:, 0:1]
    b = wb[:, 1:2]
    x = x_ref[...].astype(jnp.float32)
    o_ref[...] = (x * w + b).astype(o_ref.dtype)


# ------------------------------- helpers ----------------------------------- #
def _poly_basis(t, K):
    """[1, t, t^2, ..., t^{K-1}] via cumulative multiplication (no float pow)."""
    t32 = jnp.asarray(t, jnp.float32)
    if K == 1:
        return jnp.ones((1,), jnp.float32)
    return jnp.cumprod(
        jnp.concatenate([jnp.ones((1,), jnp.float32),
                         jnp.full((K - 1,), t32, jnp.float32)]))


def _round_up(n, m):
    return (n + m - 1) // m * m


def _sublane_base(dtype):
    """Native sublane packing: 8 for f32, 16 for bf16/f16, 32 for int8/fp8."""
    return max(8, 32 // jnp.dtype(dtype).itemsize)


# ------------------------------- wrapper ------------------------------------ #
def continuous_affine_pallas(t, x_nchw, weight_param, bias_param, basis_size,
                             *, row_tile_target=256, block_bytes_target=2 << 20,
                             min_pallas_bytes=1 << 20, donate_x=False):
    """Forward pass of ContinuousAffine.

    t:            scalar ()
    x_nchw:       (N, C, H, W)
    weight_param: (1, C, 1, 1, K)   (PyTorch parameter shape)
    bias_param:   (1, C, 1, 1, K)
    """
    N, C, H, W = x_nchw.shape
    K = basis_size
    HW = H * W
    R = N * C
    itemsize = jnp.dtype(x_nchw.dtype).itemsize

    # --- glue (plain JAX): basis eval + tiny K-contraction, hoisted out ------- #
    basis = _poly_basis(t, K)                                        # (K,)
    wv = weight_param.reshape(C, K).astype(jnp.float32) @ basis      # (C,)
    bv = bias_param.reshape(C, K).astype(jnp.float32) @ basis        # (C,)

    # --- small-problem fallback: fixed pipeline setup cost dominates --------- #
    if R * HW * itemsize < min_pallas_bytes:
        out = (x_nchw.astype(jnp.float32) * wv.reshape(1, C, 1, 1)
               + bv.reshape(1, C, 1, 1))
        return out.astype(x_nchw.dtype)

    # --- tile selection: dtype-aware sublane base, byte-based column target -- #
    base = _sublane_base(x_nchw.dtype)
    r_tile = min(row_tile_target, _round_up(R, base))                # mult of base
    col_target = max(128, (block_bytes_target // (row_tile_target * itemsize))
                     // 128 * 128)
    c_tile = min(col_target, _round_up(HW, 128))                     # mult of 128

    # v7x: need >= 2 grid steps on a "parallel" axis so both TensorCores (and
    # their independent HBM paths) are engaged on this memory-bound kernel.
    while pl.cdiv(R, r_tile) * pl.cdiv(HW, c_tile) < 2:
        if c_tile > 128:
            c_tile = max(128, (c_tile // 2) // 128 * 128)
        elif r_tile > base:
            r_tile = max(base, (r_tile // 2) // base * base)
        else:
            break

    # --- pad to the tile grid (keeps every block (8,128)-aligned, output
    #     lane-dense, and the VMEM footprint bounded) -------------------------- #
    R_pad = _round_up(R, r_tile)
    HW_pad = _round_up(HW, c_tile)

    x2d = x_nchw.reshape(R, HW)
    if (R_pad, HW_pad) != (R, HW):
        x2d = jnp.pad(x2d, ((0, R_pad - R), (0, HW_pad - HW)))

    # Fused per-row (scale, shift) table, kept in f32 for reference numerics.
    wb = jnp.stack([jnp.tile(wv, N), jnp.tile(bv, N)], axis=1)       # (R, 2) f32
    if R_pad != R:
        wb = jnp.pad(wb, ((0, R_pad - R), (0, 0)))

    grid = (R_pad // r_tile, HW_pad // c_tile)

    # Explicit scoped-VMEM budget from the actual tile footprint:
    # double-buffered x-in + out tiles, plus the (lane-padded) wb tile.
    block_bytes = r_tile * c_tile * itemsize
    footprint = 2 * (2 * block_bytes) + 2 * (r_tile * 128 * 4)
    vmem_limit = int(min(max(2 * footprint, 16 << 20), 48 << 20))

    io_alias = {}
    if donate_x and (R_pad, HW_pad) == (R, HW):
        io_alias = {1: 0}   # alias x (input 1) to the output buffer

    out2d = pl.pallas_call(
        _affine_kernel,
        out_shape=jax.ShapeDtypeStruct((R_pad, HW_pad), x_nchw.dtype),
        grid_spec=pltpu.PrefetchScalarGridSpec(
            num_scalar_prefetch=0,
            grid=grid,
            in_specs=[
                pl.BlockSpec((r_tile, 2), lambda i, j: (i, 0)),        # fused w/b
                pl.BlockSpec((r_tile, c_tile), lambda i, j: (i, j)),   # x tile
            ],
            out_specs=pl.BlockSpec((r_tile, c_tile), lambda i, j: (i, j)),
        ),
        compiler_params=pltpu.CompilerParams(
            dimension_semantics=("parallel", "parallel"),
            vmem_limit_bytes=vmem_limit),
        input_output_aliases=io_alias,
    )(wb, x2d)

    if (R_pad, HW_pad) != (R, HW):
        out2d = out2d[:R, :HW]
    return out2d.reshape(N, C, H, W)


# ------------------------------ reference ----------------------------------- #
def continuous_affine_ref(t, x_nchw, weight_param, bias_param, basis_size):
    basis = _poly_basis(t, basis_size)
    weight = jnp.einsum("abcdk,k->abcd", weight_param.astype(jnp.float32), basis)
    bias = jnp.einsum("abcdk,k->abcd", bias_param.astype(jnp.float32), basis)
    return (x_nchw.astype(jnp.float32) * weight + bias).astype(x_nchw.dtype)


if __name__ == "__main__":
    # shape=(None, C, None, None), dims=(1,)  -> linear_shape = [1, C, 1, 1, K]
    N, C, H, W = 2, 4, 16, 16
    K = 8  # basis.basis_size

    key = jax.random.PRNGKey(0)
    kx, kw, kb, kx2 = jax.random.split(key, 4)

    x = jax.random.normal(kx, (N, C, H, W), dtype=jnp.float32)

    # Module default init: weight[..., 0] = 1, weight[..., 1:] = 0, bias = 0,
    # plus a deterministic perturbation so the affine transform is non-trivial.
    weight_param = jnp.zeros((1, C, 1, 1, K), dtype=jnp.float32)
    weight_param = weight_param.at[..., 0].set(1.0)
    bias_param = jnp.zeros((1, C, 1, 1, K), dtype=jnp.float32)
    weight_param = weight_param + 0.05 * jax.random.normal(
        kw, (1, C, 1, 1, K), dtype=jnp.float32)
    bias_param = bias_param + 0.05 * jax.random.normal(
        kb, (1, C, 1, 1, K), dtype=jnp.float32)

    t = jnp.float32(0.37)

    # 1) Force the Pallas path at the small demo shape (aligned dims).
    out = continuous_affine_pallas(t, x, weight_param, bias_param, K,
                                   min_pallas_bytes=0)
    out = jax.block_until_ready(out)
    ref = continuous_affine_ref(t, x, weight_param, bias_param, K)
    assert out.shape == (N, C, H, W)
    assert jnp.allclose(out, ref, atol=1e-5, rtol=1e-5)

    # 2) Non-(8,128)-divisible shape: exercises the padding path.
    x_odd = jax.random.normal(kx2, (2, 3, 10, 10), dtype=jnp.float32)
    wp_odd = weight_param[:, :3]
    bp_odd = bias_param[:, :3]
    out_odd = continuous_affine_pallas(t, x_odd, wp_odd, bp_odd, K,
                                       min_pallas_bytes=0)
    out_odd = jax.block_until_ready(out_odd)
    ref_odd = continuous_affine_ref(t, x_odd, wp_odd, bp_odd, K)
    assert jnp.allclose(out_odd, ref_odd, atol=1e-5, rtol=1e-5)

    # 3) Default small-problem fallback path (plain JAX) matches too.
    out_fb = jax.block_until_ready(
        continuous_affine_pallas(t, x, weight_param, bias_param, K))
    assert jnp.allclose(out_fb, ref, atol=1e-5, rtol=1e-5)

    print("KERNEL_OK")
</pallas_src>

<mosaic_0001>
module attributes {stable_mosaic.version = 11 : i64} {
  func.func @_affine_kernel(%arg0: i32, %arg1: i32, %arg2: memref<8x2xf32, #tpu.memory_space<vmem>>, %arg3: memref<8x128xf32, #tpu.memory_space<vmem>>, %arg4: memref<8x128xf32, #tpu.memory_space<vmem>>) attributes {dimension_semantics = [#tpu.dimension_semantics<parallel>, #tpu.dimension_semantics<parallel>], iteration_bounds = array<i64: 1, 2>, scalar_prefetch = 0 : i64, scratch_operands = 0 : i64, tpu.core_type = #tpu.core_type<tc>, window_params = [{transform_indices = @transform_0, window_bounds = array<i64: 8, 2>}, {transform_indices = @transform_1, window_bounds = array<i64: 8, 128>}, {transform_indices = @transform_2, window_bounds = array<i64: 8, 128>}]} {
    %c0 = arith.constant 0 : index
    %c0_0 = arith.constant 0 : index
    %0 = vector.load %arg2[%c0, %c0_0] : memref<8x2xf32, #tpu.memory_space<vmem>>, vector<8x2xf32>
    %1 = vector.extract_strided_slice %0 {offsets = [0, 0], sizes = [8, 1], strides = [1, 1]} : vector<8x2xf32> to vector<8x1xf32>
    %2 = vector.extract_strided_slice %0 {offsets = [0, 1], sizes = [8, 1], strides = [1, 1]} : vector<8x2xf32> to vector<8x1xf32>
    %c0_1 = arith.constant 0 : index
    %c0_2 = arith.constant 0 : index
    %3 = vector.load %arg3[%c0_1, %c0_2] : memref<8x128xf32, #tpu.memory_space<vmem>>, vector<8x128xf32>
    %4 = vector.broadcast %1 : vector<8x1xf32> to vector<8x128xf32>
    %5 = arith.mulf %3, %4 : vector<8x128xf32>
    %6 = vector.broadcast %2 : vector<8x1xf32> to vector<8x128xf32>
    %7 = arith.addf %5, %6 : vector<8x128xf32>
    %c0_3 = arith.constant 0 : index
    %c0_4 = arith.constant 0 : index
    %8 = vector.load %arg4[%c0_3, %c0_4] : memref<8x128xf32, #tpu.memory_space<vmem>>, vector<8x128xf32>
    tpu.vector_store %arg4[%c0_3, %c0_4], %7 {strides = array<i32>} : memref<8x128xf32, #tpu.memory_space<vmem>>, vector<8x128xf32>,
    return
  }
  func.func @transform_0(%arg0: i32, %arg1: i32) -> (i32, i32) {
    %c0_i32 = arith.constant 0 : i32
    %c0_i32_0 = arith.constant 0 : i32
    return %arg0, %c0_i32 : i32, i32
  }
  func.func @transform_1(%arg0: i32, %arg1: i32) -> (i32, i32) {
    %c0_i32 = arith.constant 0 : i32
    return %arg0, %arg1 : i32, i32
  }
  func.func @transform_2(%arg0: i32, %arg1: i32) -> (i32, i32) {
    %c0_i32 = arith.constant 0 : i32
    return %arg0, %arg1 : i32, i32
  }
}

</mosaic_0001>

<bundles_post_ra>
// kernel: tpu_custom_call.1
= control target key start
LH: loop header
LB: loop body
LE: loop exit
PB: predicated region body
PF: predicated region fallthrough
CT: control target
= control target key end

     0   :  { %7 = vsyncpa [#allocation3], 0  ;;  %s659_s0 = inlined_call_operand.vmem [shape: f32[8,2], index: 0, kind: input, shape index: {}]   ;;  %s660_s1 = inlined_call_operand.hbm [shape: f32[8,256], index: 1, kind: input, shape index: {}]   ;;  %s661_s2 = inlined_call_operand.hbm [shape: f32[8,256], index: 2, kind: output, shape index: {}]  }
   0x1   :  { %9 = vsyncpa [#allocation3 + $0x1], 0 }
   0x2   :  { %10 = vsyncpa [#allocation4], 0 }
   0x3   :  { %12 = vsyncpa [#allocation4 + $0x1], 0  ;;  %s536_s9 = smov 0   ;;  %s538_s10 = smov 0  }
   0x4   :  { %s540_s11 = smov 0   ;;  %s542_s12 = smov 0  }
   0x5   :  { %s544_s13 = smov 0   ;;  %s546_s14 = smov 0  }
   0x6 LB: > { %s325_s15 = sadd.s32 4294967295, %s517_s14   ;;  %s326_s16 = sadd.s32 4294967294, %s517_s14   ;;  %s517_s14 = sphi %s546_s14, %s18_s14   ;;  %s513_s13 = sphi %s544_s13, %s670_s13   ;;  %s509_s12 = sphi %s542_s12, %s669_s12   ;;  %s505_s11 = sphi %s540_s11, %s668_s11   ;;  %s501_s10 = sphi %s538_s10, %s667_s10   ;;  %s497_s9 = sphi %s536_s9, %s666_s9  }
   0x7   : > { %s27_s17 = sadd.s32 1, %s513_s13  ;;  %s65_s18 = sadd.s32 1, %s505_s11 }
   0x8   : > { %p28_p0 = scmp.ge.s32.totalorder %s27_s17, 2  ;;  %p72_p1 = scmp.ne.s32.totalorder %s505_s11, %s501_s10 }
   0x9   : > { %p73_p2 = scmp.eq.s32.totalorder %s517_s14, 0  ;;  %p78_p3 = scmp.ne.s32.totalorder %s501_s10, %s497_s9 }
   0xa   : > { %s672_s17 = smov (%p28_p0, %s27_s17), 0  ;;  %p79_p5 = scmp.eq.s32.totalorder %s325_s15, 0 }
   0xb   : > { %p577_p4 = por %p73_p2, %p72_p1  ;;  %s61_s20 = ssub.s32 %s513_s13, %s672_s17 }
   0xc   : > { %p104_p6 = scmp.eq.s32.totalorder %s325_s15, 1  ;;  %p63_p7 = scmp.eq.s32.totalorder %s61_s20, 0 }
   0xd   : > { %p583_p8 = por %p79_p5, %p78_p3  ;;  %p110_p10 = scmp.eq.s32.totalorder %s326_s16, 1 }
   0xe   : > { %p587_p9 = por %p104_p6, %p72_p1  ;;  %p329_p12 = scmp.ge.s32.totalorder %s517_s14, 2 }
   0xf   : > { %s592_s23 = scalar_select %p63_p7, %s505_s11, %s65_s18  }
  0x10   : > { %p594_p11 = por %p110_p10, %p78_p3  ;;  %p351_p13 = scmp.lt.s32.totalorder %s517_s14, 2 }
  0x11   : > { %s137_s25 = sand.u32 1, %s505_s11   ;;  %s331_s27 = sshll.u32 %s513_s13, 3 }
  0x12   : > { %s330_s26 = sshll.u32 %s137_s25, 3  ;;  %s147_s30 = scalar_lea.hbm %s660_s1, %s331_s27 }
  0x13   : > { %s141_s3 = scalar_lea.vmem [#allocation2], %s330_s26  ;;  %s149_s5 = sshll.u32 %s147_s30, 4  ;;  %s150_s5 = int_to_ptr.hbm [resolvable:$true] %s149_s5 }
  0x14   : > { %s151_s4 = sshll.u32 %s141_s3, 4  ;;  %p344_p0 = pnand %p351_p13, %p577_p4  ;;  %s152_s4 = int_to_ptr.vmem [resolvable:$true] %s151_s4 }
  0x15   : > { %p332_p1 = scmp.ge.s32.totalorder %s517_s14, 1  ;;  %p156_p2 = scmp.lt.s32.totalorder %s517_s14, 3 }
  0x16   : > { %s138_s6 = scalar_lea.sflag [#allocation3], %s137_s25 }
  0x17   : > { %346 = dma.hbm_to_vmem [thread:$0]  (!%p344_p0), %s150_s5, 128, %s152_s4, %s138_s6  }
  0x18   : > { %p157_p3 = pnand %p332_p1, %p156_p2 }
  0x19   : > { %s610_s7 = sand.u32 (!%p157_p3), 1, %s501_s10  }
  0x1a   : > { %160 = sbr.rel (%p157_p3) target bundleno = 163 (0xa3), region = 28  ;;  %s333_s8 = sshll.u32 (!%p157_p3), %s610_s7, 3 }
  0x1b   : > { %s163_s15 = scalar_lea.sflag (!%p157_p3), [#allocation3], %s610_s7  ;;  %s166_s16 = scalar_lea.vmem (!%p157_p3), [#allocation2], %s333_s8 }
  0x1f   : > { %488 = dma.done.wait (%p583_p8), %s163_s15, 128  }
  0x20   : > { %490 = vsyncadd (%p583_p8), %s163_s15, 4294967168  ;;  %v519_v0 = vmov 0   ;;  %v196_v1 = vld [vmem:[%s659_s0] sm:$0xff]  ;;  %v520_v2 = vmov 1   ;;  %s336_s20 = sshll.u32 %s509_s12, 3  ;;  %s191_s21 = scalar_lea.vmem [#allocation5], %s333_s8 }
  0x21   : > { %403 = vset.pattern.permute.xlu0 %v519_v0  ;;  %s223_s27 = scalar_lea.hbm %s661_s2, %s336_s20  ;;  %v197_v4 = vld [vmem:[%s166_s16] sm:$0xff]  ;;  %s225_s28 = sshll.u32 %s191_s21, 4  ;;  %s226_s28 = int_to_ptr.vmem [resolvable:$true] %s225_s28 }
  0x22   : > { %200 = vperm.xlu0 %403, %v196_v1   ;;  %s227_s29 = sshll.u32 %s223_s27, 4  ;;  %s211_s30 = scalar_lea.sflag [#allocation4], %s610_s7  ;;  %s228_s29 = int_to_ptr.hbm [resolvable:$true] %s227_s29 }
  0x23   : > { %s449_s3 = sshra.s32 %s228_s29, 4  ;;  %s455_s6 = scalar_lea.hbm %s661_s2, 16  ;;  %s450_s3 = int_to_ptr.hbm [resolvable:$true] %s449_s3 }
  0x24   : > { %s451_s4 = scalar_lea.hbm %s450_s3, 8  ;;  %p456_p7 = scmp.lt.s32.totalorder %s450_s3, %s661_s2 }
  0x25   : > { %p452_p4 = scmp.ne.s32.totalorder %s450_s3, %s451_s4  ;;  %p457_p8 = scmp.lt.s32.totalorder %s455_s6, %s451_s4 }
  0x27   : > { %p453_p5 = pnand %p452_p4, %p587_p9  ;;  %p458_p10 = por %p457_p8, %p456_p7 }
  0x29   : > { %p454_p6 = pneg %p453_p5 }
  0x2a   : > { %404 = vset.pattern.permute.xlu0 %v520_v2 }
  0x2b   : > { %205 = vperm.xlu0 %404, %v196_v1   ;;  %p459_p13 = pnand %p458_p10, %p454_p6 }
  0x94   : > { %v201_v3 = vpop.permute.xlu0 %200 }
  0x95   : > { %v203_v5 = vmul.f32 %v201_v3, %v197_v4 }
  0x9d   : > { %v206_v6 = vpop.permute.xlu0 %205 }
  0x9e   : > { %v208_v7 = vadd.f32 %v206_v6, %v203_v5 }
  0xa0   : > { %209 = vst [vmem:[%s191_s21] sm:$0xff] %v208_v7 }
  0xa1   : > { %462 = shalt.err (!%p459_p13)
}
  0xa2   : > { %341 = dma.vmem_to_hbm [thread:$0]  (%p587_p9), %s226_s28, 128, %s228_s29, %s211_s30  }
  0xa3 PF: > { %s239_s7 = sand.u32 1, %s497_s9   ;;  %p348_p0 = pnand %p329_p12, %p594_p11 }
  0xa4   : > { %s240_s16 = scalar_lea.sflag [#allocation4], %s239_s7 }
  0xa5   : > { %p349_p1 = pneg %p348_p0 }
  0xa7   : > { %492 = dma.done.wait (%p349_p1), %s240_s16, 128  }
  0xa8   : > { %494 = vsyncadd (%p349_p1), %s240_s16, 4294967168  ;;  %s18_s14 = sadd.s32 1, %s517_s14   ;;  %s666_s9 = smov %s501_s10 }
  0xa9   : > { %p15_p2 = scmp.ge.s32.totalorder %s18_s14, 4   ;;  %s667_s10 = smov %s505_s11 }
  0xaa   : > { %s668_s11 = smov %s592_s23  ;;  %s669_s12 = smov %s513_s13 }
  0xab   : > { %s670_s13 = smov %s672_s17  ;;  %17 = sbr.rel (!%p15_p2) target bundleno = 6 (0x6), region = 76 }
  0xb0   :  { %246 = vsyncpa [#allocation3], 1 }
  0xb1   :  { %248 = vsyncpa [#allocation3 + $0x1], 1 }
  0xb2   :  { %249 = vsyncpa [#allocation4], 1 }
  0xb3   :  { %251 = vsyncpa [#allocation4 + $0x1], 1 }

</bundles_post_ra>
